<compile_context>
chip_gen: v7x
topology: tpu7x:2x2x1
jax: 0.10.0
libtpu: 0.0.40
codegen_flags: <defaults>
</compile_context>

<pallas_src>
import jax
import jax.numpy as jnp
from jax.experimental import pallas as pl
from jax.experimental.pallas import tpu as pltpu


_TARGET_BLOCK_BYTES = 4 * 1024 * 1024   # per pipelined buffer, f32 sizing
_MIN_BLOCK_BYTES = 1 * 1024 * 1024      # don't fragment below ~1 MiB / block
_MAX_BLOCK_ROWS = 8192


def _round_up(x: int, m: int) -> int:
    return (x + m - 1) // m * m


def _cdiv(a: int, b: int) -> int:
    return -(-a // b)


def _spatial_softmax_kernel(temp_ref, x_ref, o_ref):
    # temp_ref: SMEM (1,) f32 learnable temperature.
    # x_ref / o_ref: VMEM (TR, L) row tiles; each row is an independent softmax.
    inv_t = 1.0 / temp_ref[0]                        # scalar-unit reciprocal
    x = x_ref[...].astype(jnp.float32) * inv_t       # one VPU mul (cast is a no-op for f32)
    m = jnp.max(x, axis=-1, keepdims=True)           # XLU reduction
    e = jnp.exp(x - m)                               # EUP
    s = jnp.sum(e, axis=-1, keepdims=True)           # XLU reduction
    inv_s = 1.0 / s                                  # exact; only (TR, 1) values -> free
    o_ref[...] = (e * inv_s).astype(o_ref.dtype)


def _vmem_limit_bytes() -> int:
    cap = 128 * 1024 * 1024
    try:
        cap = int(pltpu.get_tpu_info().vmem_capacity_bytes)
    except Exception:
        pass
    # ~3/4 of physical VMEM: ~48 MiB on v7x (64 MiB), 96 MiB on v5e/v6e (128 MiB).
    return min(96 * 1024 * 1024, max(32 * 1024 * 1024, cap * 3 // 4))


def _pick_row_tile(R: int, L: int, sub: int) -> int:
    """Rows per block: biggest-block-that-fits, nudged toward >=4 grid steps."""
    row_bytes = L * 4  # size against the f32 compute intermediates
    tr = (_TARGET_BLOCK_BYTES // row_bytes) // sub * sub
    tr = max(sub, min(tr, _MAX_BLOCK_ROWS))
    if _cdiv(R, tr) < 4:
        # Shrink toward >=4 blocks (shards across both v7x TensorCores and
        # gives the auto-pipeliner work to overlap) but keep blocks >= ~1 MiB.
        floor = max(sub, (_MIN_BLOCK_BYTES // row_bytes) // sub * sub)
        tr = min(tr, max(floor, _round_up(_cdiv(R, 4), sub)))
    # Balance blocks so the ragged tail (if any) is as small as possible.
    nb = max(1, _cdiv(R, tr))
    return _round_up(_cdiv(R, nb), sub)


def spatial_softmax(feature: jax.Array, temperature) -> jax.Array:
    """feature: (B, C, H, W) NCHW; returns (B, W, C*H) softmax attention."""
    B, C, H, W = feature.shape
    L = C * H
    R = B * W
    dtype = feature.dtype
    itemsize = jnp.dtype(dtype).itemsize

    # Exact equivalent of torch .view(B, -1, C*H) on a contiguous tensor,
    # flattened to R independent softmax rows.  Row-major reshape == free view.
    feat = feature.reshape(R, L)

    sub = {1: 32, 2: 16}.get(itemsize, 8)       # native sublane multiple per dtype
    tr = _pick_row_tile(R, L, sub)
    num_blocks = _cdiv(R, tr)

    temp = jnp.asarray(temperature, jnp.float32).reshape(1)

    n = R * L
    cost = pl.CostEstimate(
        flops=4 * n,                       # mul, sub, sum-add, normalize-mul
        transcendentals=n + R,             # exp per element + recip per row
        bytes_accessed=2 * n * itemsize,   # one read + one write pass, no padding
    )

    out = pl.pallas_call(
        _spatial_softmax_kernel,
        out_shape=jax.ShapeDtypeStruct((R, L), dtype),
        grid_spec=pl.GridSpec(
            grid=(num_blocks,),
            in_specs=[
                pl.BlockSpec(memory_space=pltpu.MemorySpace.SMEM),   # temperature scalar
                pl.BlockSpec((tr, L), lambda r: (r, 0)),             # row tile, full L lanes
            ],
            out_specs=pl.BlockSpec((tr, L), lambda r: (r, 0)),
        ),
        compiler_params=pltpu.CompilerParams(
            dimension_semantics=("parallel",),
            vmem_limit_bytes=_vmem_limit_bytes(),
        ),
        cost_estimate=cost,
        # NOTE: input_output_aliases={1: 0} would save the output allocation,
        # but is skipped here so the caller's input stays valid in eager mode.
    )(temp, feat)

    # Free reshape back to the module's (B, W, C*H) output shape.
    return out.reshape(B, W, L)


def spatial_softmax_ref(feature, temperature):
    B, C, H, W = feature.shape
    t = jnp.asarray(temperature, jnp.float32).reshape(())
    feat = feature.reshape(B, W, C * H).astype(jnp.float32) / t
    return jax.nn.softmax(feat, axis=-1).astype(feature.dtype)


if __name__ == "__main__":
    key = jax.random.PRNGKey(0)
    k1, k2 = jax.random.split(key)

    # Case 1: canonical small shape, temperature Parameter init = ones(1) * 1.
    B, C, H, W = 2, 4, 16, 16
    x = jax.random.normal(k1, (B, C, H, W), dtype=jnp.float32)
    temperature = jnp.ones((1,), dtype=jnp.float32) * 1.0

    out = jax.block_until_ready(spatial_softmax(x, temperature))
    ref = spatial_softmax_ref(x, temperature)
    assert out.shape == (B, W, C * H), out.shape
    assert jnp.allclose(out, ref, atol=1e-5, rtol=1e-5), "mismatch vs reference"
    assert jnp.allclose(jnp.sum(out, axis=-1), 1.0, atol=1e-5), "rows don't sum to 1"

    # Case 2: ragged row block (R = B*W = 30, not a multiple of 8) and a
    # non-unit temperature; exercises the partial-block path (OOB rows dropped).
    B2, C2, H2, W2 = 3, 4, 16, 10
    x2 = jax.random.normal(k2, (B2, C2, H2, W2), dtype=jnp.float32)
    temp2 = jnp.ones((1,), dtype=jnp.float32) * 0.5
    out2 = jax.block_until_ready(spatial_softmax(x2, temp2))
    ref2 = spatial_softmax_ref(x2, temp2)
    assert out2.shape == (B2, W2, C2 * H2), out2.shape
    assert jnp.allclose(out2, ref2, atol=1e-5, rtol=1e-5), "mismatch vs reference (ragged)"
    assert jnp.allclose(jnp.sum(out2, axis=-1), 1.0, atol=1e-5), "rows don't sum to 1 (ragged)"

    print("KERNEL_OK")
</pallas_src>

<mosaic_0001>
module attributes {stable_mosaic.version = 11 : i64} {
  func.func @_spatial_softmax_kernel(%arg0: i32, %arg1: memref<1xf32, #tpu.memory_space<smem>>, %arg2: memref<32x64xf32, #tpu.memory_space<vmem>>, %arg3: memref<32x64xf32, #tpu.memory_space<vmem>>) attributes {dimension_semantics = [#tpu.dimension_semantics<parallel>], iteration_bounds = array<i64: 1>, scalar_prefetch = 0 : i64, scratch_operands = 0 : i64, tpu.core_type = #tpu.core_type<tc>, window_params = [{transform_indices = @transform_0, window_bounds = array<i64: 1>}, {transform_indices = @transform_1, window_bounds = array<i64: 32, 64>}, {transform_indices = @transform_2, window_bounds = array<i64: 32, 64>}]} {
    %c0 = arith.constant 0 : index
    %0 = memref.load %arg1[%c0] : memref<1xf32, #tpu.memory_space<smem>>
    %cst = arith.constant 1.000000e+00 : f32
    %1 = arith.divf %cst, %0 : f32
    %c0_0 = arith.constant 0 : index
    %c0_1 = arith.constant 0 : index
    %2 = vector.load %arg2[%c0_0, %c0_1] : memref<32x64xf32, #tpu.memory_space<vmem>>, vector<32x64xf32>
    %3 = vector.broadcast %1 : f32 to vector<32x64xf32>
    %4 = arith.mulf %2, %3 : vector<32x64xf32>
    %cst_2 = arith.constant dense<0xFF800000> : vector<32xf32>
    %5 = vector.multi_reduction <maximumf>, %4, %cst_2 [1] : vector<32x64xf32> to vector<32xf32>
    %6 = vector.shape_cast %5 : vector<32xf32> to vector<32x1xf32>
    %7 = vector.broadcast %6 : vector<32x1xf32> to vector<32x64xf32>
    %8 = arith.subf %4, %7 : vector<32x64xf32>
    %9 = math.exp %8 : vector<32x64xf32>
    %cst_3 = arith.constant dense<0.000000e+00> : vector<32xf32>
    %10 = vector.multi_reduction <add>, %9, %cst_3 [1] : vector<32x64xf32> to vector<32xf32>
    %11 = vector.shape_cast %10 : vector<32xf32> to vector<32x1xf32>
    %cst_4 = arith.constant 1.000000e+00 : f32
    %12 = vector.broadcast %cst_4 : f32 to vector<32x1xf32>
    %13 = arith.divf %12, %11 : vector<32x1xf32>
    %14 = vector.broadcast %13 : vector<32x1xf32> to vector<32x64xf32>
    %15 = arith.mulf %9, %14 : vector<32x64xf32>
    %c0_5 = arith.constant 0 : index
    %c0_6 = arith.constant 0 : index
    %16 = vector.load %arg3[%c0_5, %c0_6] : memref<32x64xf32, #tpu.memory_space<vmem>>, vector<32x64xf32>
    tpu.vector_store %arg3[%c0_5, %c0_6], %15 {strides = array<i32>} : memref<32x64xf32, #tpu.memory_space<vmem>>, vector<32x64xf32>,
    return
  }
  func.func @transform_0(%arg0: i32) -> i32 {
    %c0_i32 = arith.constant 0 : i32
    %c0_i32_0 = arith.constant 0 : i32
    return %c0_i32 : i32
  }
  func.func @transform_1(%arg0: i32) -> (i32, i32) {
    %c0_i32 = arith.constant 0 : i32
    %c0_i32_0 = arith.constant 0 : i32
    return %arg0, %c0_i32 : i32, i32
  }
  func.func @transform_2(%arg0: i32) -> (i32, i32) {
    %c0_i32 = arith.constant 0 : i32
    %c0_i32_0 = arith.constant 0 : i32
    return %arg0, %c0_i32 : i32, i32
  }
}

</mosaic_0001>

<bundles_post_ra>
// kernel: tpu_custom_call.1
= control target key start
LH: loop header
LB: loop body
LE: loop exit
PB: predicated region body
PF: predicated region fallthrough
CT: control target
= control target key end

     0   :  { %8 = vsyncpa [#allocation4], 0  ;;  %s246_s0 = inlined_call_operand.<no memory space> [shape: f32[1], index: 0, kind: input, shape index: {}]   ;;  %s247_s1 = inlined_call_operand.hbm [shape: f32[32,64], index: 1, kind: input, shape index: {}]   ;;  %s248_s2 = inlined_call_operand.hbm [shape: f32[32,64], index: 2, kind: output, shape index: {}]  }
   0x1   :  { %9 = vsyncpa [#allocation5], 0  ;;  %s182_s9 = smov [#allocation3]   ;;  %s134_s13 = scalar_lea.hbm %s247_s1, 512 }
   0x2   :  { %s17_s10 = sshll.u32 %s182_s9, 4  ;;  %p135_p0 = scmp.ne.s32.totalorder %s247_s1, %s134_s13  ;;  %s18_s10 = int_to_ptr.vmem [resolvable:$true] %s17_s10 }
   0x3   :  { %p138_p1 = scmp.lt.u32.totalorder %s134_s13, %s247_s1 }
   0x5   :  { %p140_p2 = pnand %p138_p1, %p135_p0 }
   0x7   :  { %143 = shalt.err (!%p140_p2)
}
   0x8   :  { %s144_s18 = scalar_lea.vmem %s18_s10, 512  ;;  %p149_p4 = scmp.lt.s32.totalorder %s18_s10, %s18_s10 }
   0x9   :  { %p145_p3 = scmp.ne.s32.totalorder %s18_s10, %s144_s18  ;;  %p150_p5 = scmp.lt.s32.totalorder %s144_s18, %s144_s18 }
   0xb   :  { %p151_p6 = por %p150_p5, %p149_p4 }
   0xd   :  { %p152_p7 = pnand %p151_p6, %p145_p3 }
   0xf   :  { %155 = shalt.err (!%p152_p7)
}
  0x10   :  { %s183_s19 = smov 128   ;;  %s184_s20 = smov 8   ;;  %v28_v0 = vstv %s246_s0 }
  0x11   :  { %23 = dma.hbm_to_vmem [thread:$0]  %s247_s1, 512, %s18_s10, [#allocation4], %s183_s19, %s183_s19, %s184_s20  }
  0x12   :  { %178 = dma.done.wait [#allocation4], 512  }
  0x13   :  { %179 = vsyncadd [#allocation4], 4294966784  ;;  %116 = vrcp.f32 %v28_v0  ;;  %v33_v2 = vld [vmem:[#allocation3 + $0x10] sm:$0xff]  ;;  %v31_v3 = vld [vmem:[#allocation3] sm:$0xff]  ;;  %vm40_vm0 = vcmask 523264   ;;  %s185_s0 = smov [#allocation6]  }
  0x14   :  { %v34_v5 = vld [vmem:[#allocation3 + $0x18] sm:$0xff]  ;;  %v32_v6 = vld [vmem:[#allocation3 + $0x8] sm:$0xff]  ;;  %s98_s1 = sshll.u32 %s185_s0, 4  ;;  %s99_s1 = int_to_ptr.vmem [resolvable:$true] %s98_s1 }
  0x15   :  { %s156_s26 = scalar_lea.vmem %s99_s1, 512  ;;  %p161_p9 = scmp.lt.s32.totalorder %s99_s1, %s99_s1 }
  0x16   :  { %p157_p8 = scmp.ne.s32.totalorder %s99_s1, %s156_s26  ;;  %p162_p10 = scmp.lt.s32.totalorder %s156_s26, %s156_s26 }
  0x18   :  { %p163_p11 = por %p162_p10, %p161_p9 }
  0x1a   :  { %p164_p12 = pnand %p163_p11, %p157_p8 }
  0x1d   :  { %v117_v1 = vpop.eup %116 }
  0x1e   :  { %110 = vpush %v117_v1 }
  0x4f   :  { %s111_s25 = spop %110 }
  0x50   :  { %v35_v4 = vstv %s111_s25 }
  0x51   :  { %v38_v7 = vmul.f32 %v35_v4, %v33_v2  ;;  %v36_v8 = vmul.f32 %v35_v4, %v31_v3  ;;  %v39_v11 = vmul.f32 %v35_v4, %v34_v5  ;;  %v37_v12 = vmul.f32 %v35_v4, %v32_v6 }
  0x53   :  { %v47_v9 = vsel %vm40_vm0, %v38_v7, -inf  ;;  %v41_v10 = vsel %vm40_vm0, %v36_v8, -inf  ;;  %v50_v13 = vsel %vm40_vm0, %v39_v11, -inf  ;;  %v44_v14 = vsel %vm40_vm0, %v37_v12, -inf }
  0x54   :  { %48 = vmax.xlane.f32.xlu1 %v47_v9  ;;  %42 = vmax.xlane.f32.xlu0 %v41_v10 }
  0x58   :  { %51 = vmax.xlane.f32.xlu1 %v50_v13  ;;  %45 = vmax.xlane.f32.xlu0 %v44_v14 }
  0xe1   :  { %v49_v15 = vpop.xlane.xlu1 %48  ;;  %v43_v16 = vpop.xlane.xlu0 %42 }
  0xe2   :  { %v55_v17 = vsub.f32 %v38_v7, %v49_v15  ;;  %v53_v18 = vsub.f32 %v36_v8, %v43_v16 }
  0xe4   :  { %v57_v19 = vmul.f32 1.442695, %v53_v18  ;;  %v61_v20 = vmul.f32 1.442695, %v55_v17 }
  0xe5   :  { %v52_v21 = vpop.xlane.xlu1 %51  ;;  %v46_v22 = vpop.xlane.xlu0 %45 }
  0xe6   :  { %v56_v23 = vsub.f32 %v39_v11, %v52_v21  ;;  %v54_v24 = vsub.f32 %v37_v12, %v46_v22  ;;  %118 = vpow2.f32 %v57_v19 }
  0xe7   :  { %120 = vpow2.f32 %v61_v20 }
  0xe8   :  { %v59_v25 = vmul.f32 1.442695, %v54_v24  ;;  %v63_v26 = vmul.f32 1.442695, %v56_v23 }
  0xea   :  { %122 = vpow2.f32 %v59_v25 }
  0xeb   :  { %124 = vpow2.f32 %v63_v26 }
  0xf0   :  { %v119_v27 = vpop.eup %118 }
  0xf1   :  { %v65_v28 = vsel %vm40_vm0, %v119_v27, 0.0  ;;  %v121_v29 = vpop.eup %120 }
  0xf2   :  { %66 = vadd.xlane.f32.xlu0 %v65_v28  ;;  %v71_v31 = vsel %vm40_vm0, %v121_v29, 0.0 }
  0xf4   :  { %v123_v30 = vpop.eup %122 }
  0xf5   :  { %v68_v32 = vsel %vm40_vm0, %v123_v30, 0.0  ;;  %v125_v33 = vpop.eup %124 }
  0xf6   :  { %72 = vadd.xlane.f32.xlu0 %v71_v31  ;;  %69 = vadd.xlane.f32.xlu1 %v68_v32  ;;  %v74_v34 = vsel %vm40_vm0, %v125_v33, 0.0 }
  0xfa   :  { %75 = vadd.xlane.f32.xlu1 %v74_v34 }
 0x17f   :  { %v67_v35 = vpop.xlane.xlu0 %66 }
 0x180   :  { %126 = vrcp.f32 %v67_v35 }
 0x183   :  { %v70_v36 = vpop.xlane.xlu1 %69  ;;  %v73_v37 = vpop.xlane.xlu0 %72 }
 0x184   :  { %128 = vrcp.f32 %v70_v36 }
 0x185   :  { %130 = vrcp.f32 %v73_v37 }
 0x187   :  { %v76_v38 = vpop.xlane.xlu1 %75 }
 0x188   :  { %132 = vrcp.f32 %v76_v38 }
 0x18a   :  { %v127_v39 = vpop.eup %126 }
 0x18b   :  { %v85_v40 = vmul.f32 %v127_v39, %v119_v27 }
 0x18d   :  { %89 = vst.msk [vmem:[#allocation6] sm:$0xff] %vm40_vm0, %v85_v40 }
 0x18e   :  { %v129_v41 = vpop.eup %128 }
 0x18f   :  { %v131_v42 = vpop.eup %130  ;;  %v86_v43 = vmul.f32 %v129_v41, %v123_v30 }
 0x190   :  { %v87_v44 = vmul.f32 %v131_v42, %v121_v29 }
 0x191   :  { %90 = vst.msk [vmem:[#allocation6 + $0x8] sm:$0xff] %vm40_vm0, %v86_v43 }
 0x192   :  { %v133_v45 = vpop.eup %132  ;;  %91 = vst.msk [vmem:[#allocation6 + $0x10] sm:$0xff] %vm40_vm0, %v87_v44 }
 0x193   :  { %v88_v46 = vmul.f32 %v133_v45, %v125_v33 }
 0x195   :  { %92 = vst.msk [vmem:[#allocation6 + $0x18] sm:$0xff] %vm40_vm0, %v88_v46 }
 0x196   :  { %167 = shalt.err (!%p164_p12)
}
 0x197   :  { %s168_s29 = scalar_lea.hbm %s248_s2, 512 }
 0x198   :  { %p169_p13 = scmp.ne.s32.totalorder %s248_s2, %s168_s29  ;;  %p172_p0 = scmp.lt.u32.totalorder %s168_s29, %s248_s2 }
 0x19a   :  { %p174_p1 = pnand %p172_p0, %p169_p13 }
 0x19c   :  { %177 = shalt.err (!%p174_p1)
}
 0x19d   :  { %104 = dma.vmem_to_hbm [thread:$0]  %s99_s1, 512, %s248_s2, [#allocation5], %s183_s19, %s183_s19, %s184_s20  }
 0x19e   :  { %180 = dma.done.wait [#allocation5], 512  }
 0x19f   :  { %181 = vsyncadd [#allocation5], 4294966784 }
 0x1a0   :  { %108 = vsyncpa [#allocation4], 1 }
 0x1a1   :  { %109 = vsyncpa [#allocation5], 1 }

</bundles_post_ra>
